<compile_context>
chip_gen: v5e
topology: v5e:2x2
jax: 0.10.0
libtpu: 0.0.40
codegen_flags: <defaults>
</compile_context>

<pallas_src>
import jax
import jax.numpy as jnp
from jax.experimental import pallas as pl
from jax.experimental.pallas import tpu as pltpu


def _round_up(a, b):
    return ((a + b - 1) // b) * b


def _choose_tile_h(H, W, itemsize, block_budget_bytes=4 * 1024 * 1024):
    """Pick a row tile (multiple of 8) so one block stays ~<= 4 MiB."""
    h8 = _round_up(H, 8)
    max_rows = max(8, ((block_budget_bytes // max(W * itemsize, 1)) // 8) * 8)
    return min(h8, max_rows)


def find_1channel_edge_coarse_edge(x, *, tile_h=None):
    """x: (N, C, H, W). Returns sqrt(dv^2 + dh^2 + 1e-6) of channel 0 -> (N, 1, H, W)."""
    N, C, H, W = x.shape
    itemsize = x.dtype.itemsize

    if tile_h is None:
        TILE_H = _choose_tile_h(H, W, itemsize)
    else:
        TILE_H = min(_round_up(int(tile_h), 8), _round_up(H, 8))

    NT = pl.cdiv(H, TILE_H)       # row tiles per image (partial last tile is masked)
    HALO = 8                      # sublane-aligned halo slab height
    TB = TILE_H // 8              # 8-row blocks per row tile
    HB8 = pl.cdiv(H, 8)           # number of 8-row halo blocks along H

    def kernel(x_ref, above_ref, below_ref, o_ref):
        # x_ref: (1, 1, TILE_H, W) tile of channel 0; halo refs: (1, 1, 8, W) slabs.
        x = x_ref[0, 0].astype(jnp.float32)                       # (TILE_H, W)
        above = above_ref[0, 0].astype(jnp.float32)[HALO - 1:HALO, :]  # row just above tile, (1, W)
        below = below_ref[0, 0].astype(jnp.float32)[0:1, :]            # row just below tile, (1, W)

        lrow = jax.lax.broadcasted_iota(jnp.int32, (TILE_H, W), 0)  # local row
        col = jax.lax.broadcasted_iota(jnp.int32, (TILE_H, W), 1)   # column
        grow = lrow + pl.program_id(1) * TILE_H                     # global row

        # Vertical: v[i,j] = x[i+1,j] - x[i-1,j]  (zero term outside the image).
        x_dn = pltpu.roll(x, TILE_H - 1, axis=0)                 # x[l+1] (cyclic)
        x_dn = jnp.where(lrow == TILE_H - 1, below, x_dn)        # stitch tile boundary w/ halo
        x_dn = jnp.where(grow == H - 1, 0.0, x_dn)               # image bottom border
        x_up = pltpu.roll(x, 1, axis=0)                          # x[l-1] (cyclic)
        x_up = jnp.where(lrow == 0, above, x_up)                 # stitch tile boundary w/ halo
        x_up = jnp.where(grow == 0, 0.0, x_up)                   # image top border
        v = x_dn - x_up

        # Horizontal: h[i,j] = x[i,j+1] - x[i,j-1]  (zero term outside the image).
        x_rt = pltpu.roll(x, W - 1, axis=1)                      # x[:, j+1] (cyclic)
        x_rt = jnp.where(col == W - 1, 0.0, x_rt)
        x_lt = pltpu.roll(x, 1, axis=1)                          # x[:, j-1] (cyclic)
        x_lt = jnp.where(col == 0, 0.0, x_lt)
        h = x_rt - x_lt

        o_ref[0, 0] = jnp.sqrt(v * v + h * h + jnp.float32(1e-6)).astype(o_ref.dtype)

    # Explicit VMEM budget: double-buffered (input tile + 2 halo slabs + output tile).
    in_block = TILE_H * W * itemsize
    halo_block = HALO * W * itemsize
    working = 2 * (in_block + 2 * halo_block + in_block)
    vmem_limit = int(max(2 * working, 32 * 1024 * 1024))

    in_specs = [
        # Main tile: channel 0 is selected by the index_map -> only channel 0 is DMA'd.
        pl.BlockSpec((1, 1, TILE_H, W), lambda n, t: (n, 0, t, 0)),
        # 8-row slab containing the row just above the tile (clamped at the first tile;
        # its contribution is zeroed in-kernel by the grow==0 mask there).
        pl.BlockSpec((1, 1, HALO, W),
                     lambda n, t: (n, 0, jnp.maximum(t * TB - 1, 0), 0)),
        # 8-row slab containing the row just below the tile (clamped at the last tile;
        # its contribution is zeroed/discarded there).
        pl.BlockSpec((1, 1, HALO, W),
                     lambda n, t: (n, 0, jnp.minimum((t + 1) * TB, HB8 - 1), 0)),
    ]

    return pl.pallas_call(
        kernel,
        out_shape=jax.ShapeDtypeStruct((N, 1, H, W), x.dtype),
        grid=(N, NT),
        in_specs=in_specs,
        out_specs=pl.BlockSpec((1, 1, TILE_H, W), lambda n, t: (n, 0, t, 0)),
        compiler_params=pltpu.CompilerParams(
            dimension_semantics=("parallel", "parallel"),
            vmem_limit_bytes=vmem_limit),
    )(x, x, x)


def _reference(x):
    # Pure-JAX reference with identical semantics (for verification).
    x0 = x[:, 0]                                        # (N, H, W)
    H, W = x0.shape[1], x0.shape[2]
    xp = jnp.pad(x0, ((0, 0), (1, 1), (1, 1)))          # zero pad H, W
    v = xp[:, 2:H + 2, 1:W + 1] - xp[:, 0:H, 1:W + 1]
    h = xp[:, 1:H + 1, 2:W + 2] - xp[:, 1:H + 1, 0:W]
    return jnp.sqrt(v * v + h * h + 1e-6)[:, None, :, :]


if __name__ == "__main__":
    key = jax.random.PRNGKey(0)
    k1, k2 = jax.random.split(key)

    # Small NCHW input; W kept lane-dense (multiple of 128) per the perf review.
    x = jax.random.normal(k1, (2, 4, 16, 128), dtype=jnp.float32)
    out = jax.block_until_ready(find_1channel_edge_coarse_edge(x))
    ref = _reference(x)
    assert out.shape == (2, 1, 16, 128), out.shape
    assert jnp.allclose(out, ref, atol=1e-5, rtol=1e-5), "mismatch vs reference (single tile)"

    # Exercise the multi-row-tile path (halo stitching + partial last tile).
    x2 = jax.random.normal(k2, (1, 3, 40, 128), dtype=jnp.float32)
    out2 = jax.block_until_ready(find_1channel_edge_coarse_edge(x2, tile_h=16))
    ref2 = _reference(x2)
    assert out2.shape == (1, 1, 40, 128), out2.shape
    assert jnp.allclose(out2, ref2, atol=1e-5, rtol=1e-5), "mismatch vs reference (row tiled)"

    print("KERNEL_OK")
</pallas_src>

<mosaic_0001>
module attributes {stable_mosaic.version = 11 : i64} {
  func.func @kernel(%arg0: i32, %arg1: i32, %arg2: memref<1x1x16x128xf32, #tpu.memory_space<vmem>>, %arg3: memref<1x1x8x128xf32, #tpu.memory_space<vmem>>, %arg4: memref<1x1x8x128xf32, #tpu.memory_space<vmem>>, %arg5: memref<1x1x16x128xf32, #tpu.memory_space<vmem>>) attributes {dimension_semantics = [#tpu.dimension_semantics<parallel>, #tpu.dimension_semantics<parallel>], iteration_bounds = array<i64: 2, 1>, scalar_prefetch = 0 : i64, scratch_operands = 0 : i64, tpu.core_type = #tpu.core_type<tc>, window_params = [{transform_indices = @transform_0, window_bounds = array<i64: 1, 1, 16, 128>}, {transform_indices = @transform_1, window_bounds = array<i64: 1, 1, 8, 128>}, {transform_indices = @transform_2, window_bounds = array<i64: 1, 1, 8, 128>}, {transform_indices = @transform_3, window_bounds = array<i64: 1, 1, 16, 128>}]} {
    %c0 = arith.constant 0 : index
    %c0_0 = arith.constant 0 : index
    %c0_1 = arith.constant 0 : index
    %c0_2 = arith.constant 0 : index
    %0 = vector.load %arg2[%c0, %c0_0, %c0_1, %c0_2] : memref<1x1x16x128xf32, #tpu.memory_space<vmem>>, vector<1x1x16x128xf32>
    %1 = vector.shape_cast %0 : vector<1x1x16x128xf32> to vector<16x128xf32>
    %c0_3 = arith.constant 0 : index
    %c0_4 = arith.constant 0 : index
    %c0_5 = arith.constant 0 : index
    %c0_6 = arith.constant 0 : index
    %2 = vector.load %arg3[%c0_3, %c0_4, %c0_5, %c0_6] : memref<1x1x8x128xf32, #tpu.memory_space<vmem>>, vector<1x1x8x128xf32>
    %3 = vector.shape_cast %2 : vector<1x1x8x128xf32> to vector<8x128xf32>
    %4 = vector.extract_strided_slice %3 {offsets = [7, 0], sizes = [1, 128], strides = [1, 1]} : vector<8x128xf32> to vector<1x128xf32>
    %c0_7 = arith.constant 0 : index
    %c0_8 = arith.constant 0 : index
    %c0_9 = arith.constant 0 : index
    %c0_10 = arith.constant 0 : index
    %5 = vector.load %arg4[%c0_7, %c0_8, %c0_9, %c0_10] : memref<1x1x8x128xf32, #tpu.memory_space<vmem>>, vector<1x1x8x128xf32>
    %6 = vector.shape_cast %5 : vector<1x1x8x128xf32> to vector<8x128xf32>
    %7 = vector.extract_strided_slice %6 {offsets = [0, 0], sizes = [1, 128], strides = [1, 1]} : vector<8x128xf32> to vector<1x128xf32>
    %8 = tpu.iota {dimensions = array<i32: 0>} : vector<16x128xi32>
    %9 = tpu.iota {dimensions = array<i32: 1>} : vector<16x128xi32>
    %c16_i32 = arith.constant 16 : i32
    %10 = arith.muli %arg1, %c16_i32 : i32
    %11 = vector.broadcast %10 : i32 to vector<16x128xi32>
    %12 = arith.addi %8, %11 : vector<16x128xi32>
    %c15_i32 = arith.constant 15 : i32
    %13 = tpu.dynamic_rotate %1 by %c15_i32 dim 0 : vector<16x128xf32>, i32 -> vector<16x128xf32>
    %c15_i32_11 = arith.constant 15 : i32
    %14 = vector.broadcast %c15_i32_11 : i32 to vector<16x128xi32>
    %15 = arith.cmpi eq, %8, %14 : vector<16x128xi32>
    %16 = vector.shape_cast %7 : vector<1x128xf32> to vector<1x128xf32>
    %17 = vector.broadcast %16 : vector<1x128xf32> to vector<16x128xf32>
    %18 = arith.select %15, %17, %13 : vector<16x128xi1>, vector<16x128xf32>
    %c15_i32_12 = arith.constant 15 : i32
    %19 = vector.broadcast %c15_i32_12 : i32 to vector<16x128xi32>
    %20 = arith.cmpi eq, %12, %19 : vector<16x128xi32>
    %cst = arith.constant 0.000000e+00 : f32
    %21 = vector.broadcast %cst : f32 to vector<16x128xf32>
    %22 = arith.select %20, %21, %18 : vector<16x128xi1>, vector<16x128xf32>
    %c1_i32 = arith.constant 1 : i32
    %23 = tpu.dynamic_rotate %1 by %c1_i32 dim 0 : vector<16x128xf32>, i32 -> vector<16x128xf32>
    %c0_i32 = arith.constant 0 : i32
    %24 = vector.broadcast %c0_i32 : i32 to vector<16x128xi32>
    %25 = arith.cmpi eq, %8, %24 : vector<16x128xi32>
    %26 = vector.shape_cast %4 : vector<1x128xf32> to vector<1x128xf32>
    %27 = vector.broadcast %26 : vector<1x128xf32> to vector<16x128xf32>
    %28 = arith.select %25, %27, %23 : vector<16x128xi1>, vector<16x128xf32>
    %c0_i32_13 = arith.constant 0 : i32
    %29 = vector.broadcast %c0_i32_13 : i32 to vector<16x128xi32>
    %30 = arith.cmpi eq, %12, %29 : vector<16x128xi32>
    %cst_14 = arith.constant 0.000000e+00 : f32
    %31 = vector.broadcast %cst_14 : f32 to vector<16x128xf32>
    %32 = arith.select %30, %31, %28 : vector<16x128xi1>, vector<16x128xf32>
    %33 = arith.subf %22, %32 : vector<16x128xf32>
    %c127_i32 = arith.constant 127 : i32
    %34 = tpu.dynamic_rotate %1 by %c127_i32 dim 1 : vector<16x128xf32>, i32 -> vector<16x128xf32>
    %c127_i32_15 = arith.constant 127 : i32
    %35 = vector.broadcast %c127_i32_15 : i32 to vector<16x128xi32>
    %36 = arith.cmpi eq, %9, %35 : vector<16x128xi32>
    %cst_16 = arith.constant 0.000000e+00 : f32
    %37 = vector.broadcast %cst_16 : f32 to vector<16x128xf32>
    %38 = arith.select %36, %37, %34 : vector<16x128xi1>, vector<16x128xf32>
    %c1_i32_17 = arith.constant 1 : i32
    %39 = tpu.dynamic_rotate %1 by %c1_i32_17 dim 1 : vector<16x128xf32>, i32 -> vector<16x128xf32>
    %c0_i32_18 = arith.constant 0 : i32
    %40 = vector.broadcast %c0_i32_18 : i32 to vector<16x128xi32>
    %41 = arith.cmpi eq, %9, %40 : vector<16x128xi32>
    %cst_19 = arith.constant 0.000000e+00 : f32
    %42 = vector.broadcast %cst_19 : f32 to vector<16x128xf32>
    %43 = arith.select %41, %42, %39 : vector<16x128xi1>, vector<16x128xf32>
    %44 = arith.subf %38, %43 : vector<16x128xf32>
    %45 = arith.mulf %33, %33 : vector<16x128xf32>
    %46 = arith.mulf %44, %44 : vector<16x128xf32>
    %47 = arith.addf %45, %46 : vector<16x128xf32>
    %cst_20 = arith.constant 9.99999997E-7 : f32
    %48 = vector.broadcast %cst_20 : f32 to vector<16x128xf32>
    %49 = arith.addf %47, %48 : vector<16x128xf32>
    %50 = math.sqrt %49 : vector<16x128xf32>
    %c0_21 = arith.constant 0 : index
    %c0_22 = arith.constant 0 : index
    %c0_23 = arith.constant 0 : index
    %c0_24 = arith.constant 0 : index
    %51 = vector.load %arg5[%c0_21, %c0_22, %c0_23, %c0_24] : memref<1x1x16x128xf32, #tpu.memory_space<vmem>>, vector<1x1x16x128xf32>
    %52 = vector.shape_cast %51 : vector<1x1x16x128xf32> to vector<16x128xf32>
    %53 = vector.shape_cast %50 : vector<16x128xf32> to vector<1x1x16x128xf32>
    tpu.vector_store %arg5[%c0_21, %c0_22, %c0_23, %c0_24], %53 {strides = array<i32>} : memref<1x1x16x128xf32, #tpu.memory_space<vmem>>, vector<1x1x16x128xf32>,
    return
  }
  func.func @transform_0(%arg0: i32, %arg1: i32) -> (i32, i32, i32, i32) {
    %c0_i32 = arith.constant 0 : i32
    %c0_i32_0 = arith.constant 0 : i32
    %c0_i32_1 = arith.constant 0 : i32
    return %arg0, %c0_i32, %arg1, %c0_i32_0 : i32, i32, i32, i32
  }
  func.func @transform_1(%arg0: i32, %arg1: i32) -> (i32, i32, i32, i32) {
    %c2_i32 = arith.constant 2 : i32
    %0 = arith.muli %arg1, %c2_i32 : i32
    %c1_i32 = arith.constant 1 : i32
    %1 = arith.subi %0, %c1_i32 : i32
    %c0_i32 = arith.constant 0 : i32
    %2 = arith.maxsi %1, %c0_i32 : i32
    %c0_i32_0 = arith.constant 0 : i32
    %c0_i32_1 = arith.constant 0 : i32
    %c0_i32_2 = arith.constant 0 : i32
    return %arg0, %c0_i32_0, %2, %c0_i32_1 : i32, i32, i32, i32
  }
  func.func @transform_2(%arg0: i32, %arg1: i32) -> (i32, i32, i32, i32) {
    %c1_i32 = arith.constant 1 : i32
    %0 = arith.addi %arg1, %c1_i32 : i32
    %c2_i32 = arith.constant 2 : i32
    %1 = arith.muli %0, %c2_i32 : i32
    %c1_i32_0 = arith.constant 1 : i32
    %2 = arith.minsi %1, %c1_i32_0 : i32
    %c0_i32 = arith.constant 0 : i32
    %c0_i32_1 = arith.constant 0 : i32
    %c0_i32_2 = arith.constant 0 : i32
    return %arg0, %c0_i32, %2, %c0_i32_1 : i32, i32, i32, i32
  }
  func.func @transform_3(%arg0: i32, %arg1: i32) -> (i32, i32, i32, i32) {
    %c0_i32 = arith.constant 0 : i32
    %c0_i32_0 = arith.constant 0 : i32
    %c0_i32_1 = arith.constant 0 : i32
    return %arg0, %c0_i32, %arg1, %c0_i32_0 : i32, i32, i32, i32
  }
}

</mosaic_0001>

<bundles_post_ra>
// kernel: tpu_custom_call.1
= control target key start
LH: loop header
LB: loop body
LE: loop exit
PB: predicated region body
PF: predicated region fallthrough
CT: control target
= control target key end

     0   :  { %s1055_s0 = inlined_call_operand.hbm [shape: f32[2,4,16,128], index: 0, kind: input, shape index: {}]   ;;  %s1056_s1 = inlined_call_operand.hbm [shape: f32[2,4,16,128], index: 1, kind: input, shape index: {}]   ;;  %s1057_s2 = inlined_call_operand.hbm [shape: f32[2,4,16,128], index: 2, kind: input, shape index: {}]   ;;  %s1058_s3 = inlined_call_operand.hbm [shape: f32[2,1,16,128], index: 3, kind: output, shape index: {}]  }
   0x1   :  { %1062 = sst [smem:[#allocation16_spill]] %s1055_s0 }
   0x2   :  { %1063 = sst [smem:[#allocation17_spill]] %s1056_s1 }
   0x3   :  { %8 = vsyncpa [#allocation3], 0 }
   0x4   :  { %10 = vsyncpa [#allocation3 + $0x1], 0 }
   0x5   :  { %11 = vsyncpa [#allocation6], 0 }
   0x6   :  { %13 = vsyncpa [#allocation6 + $0x1], 0 }
   0x7   :  { %14 = vsyncpa [#allocation4], 0 }
   0x8   :  { %16 = vsyncpa [#allocation4 + $0x1], 0  ;;  %s886_s12 = smov 0   ;;  %s888_s13 = smov 0  }
   0x9   :  { %s890_s14 = smov 0   ;;  %s892_s15 = smov 0  }
   0xa   :  { %s894_s16 = smov 0   ;;  %s896_s17 = smov 0  }
   0xb LB: > { %1064 = sst [smem:[#allocation12_spill]] %s846_s14  ;;  %s917_s18 = sadd.s32 4294967295, %s858_s17   ;;  %s858_s17 = sphi %s896_s17, %s22_s17   ;;  %s854_s16 = sphi %s894_s16, %s1079_s16   ;;  %s850_s15 = sphi %s892_s15, %s1078_s15   ;;  %s846_s14 = sphi %s890_s14, %s1077_s14   ;;  %s842_s13 = sphi %s888_s13, %s1081_s13   ;;  %s838_s12 = sphi %s886_s12, %s1080_s12  }
   0xc   : > { %1065 = sst [smem:[#allocation13_spill]] %s854_s16  ;;  %s572_s19 = sadd.s32 4294967294, %s858_s17  }
   0xd   : > { %s34_s20 = sadd.s32 1, %s854_s16  ;;  %s43_s21 = sadd.s32 1, %s846_s14 }
   0xe   : > { %p36_p0 = scmp.ge.s32.totalorder %s34_s20, 2  ;;  %p50_p1 = scmp.ne.s32.totalorder %s846_s14, %s842_s13 }
   0xf   : > { %p51_p2 = scmp.eq.s32.totalorder %s858_s17, 0  ;;  %p56_p3 = scmp.ne.s32.totalorder %s842_s13, %s838_s12 }
  0x10   : > { %s1083_s20 = smov (%p36_p0, %s34_s20), 0  ;;  %p57_p5 = scmp.eq.s32.totalorder %s917_s18, 0 }
  0x11   : > { %1066 = sst [smem:[#allocation14_spill]] %s1083_s20  ;;  %p929_p4 = por %p51_p2, %p50_p1 }
  0x12   : > { %s38_s23 = ssub.s32 %s854_s16, %s1083_s20  ;;  %p154_p6 = scmp.eq.s32.totalorder %s917_s18, 1 }
  0x13   : > { %p41_p7 = scmp.eq.s32.totalorder %s38_s23, 0  ;;  %p937_p8 = por %p57_p5, %p56_p3 }
  0x14   : > { %p941_p9 = por %p154_p6, %p50_p1  ;;  %p160_p10 = scmp.eq.s32.totalorder %s572_s19, 1 }
  0x15   : > { %s946_s26 = scalar_select %p41_p7, %s846_s14, %s43_s21  }
  0x16   : > { %p948_p11 = por %p160_p10, %p56_p3  ;;  %p574_p12 = scmp.ge.s32.totalorder %s858_s17, 2 }
  0x17   : > { %1070 = sst [smem:[#allocation15_spill]] %s946_s26  ;;  %p622_p13 = scmp.lt.s32.totalorder %s858_s17, 2 }
  0x18   : > { %s955_s28 = sand.u32 1, %s846_s14   ;;  %s958_s29 = sshll.u32 %s854_s16, 6 }
  0x19   : > { %s204_s30 = sand.u32 1, %s858_s17   ;;  %s1072_s0 = sld [smem:[#allocation16_spill]] }
  0x1a   : > { %p967_p0 = pnand %p622_p13, %p929_p4  ;;  %s578_s8 = sshll.u32 %s955_s28, 3 }
  0x1b   : > { %s1074_s1 = sld [smem:[#allocation17_spill]]  ;;  %s208_s19 = scalar_lea.vmem [#allocation5], %s578_s8 }
  0x1c   : > { %s222_s21 = sshll.u32 %s208_s19, 4  ;;  %s205_s4 = scalar_lea.sflag [#allocation6], %s204_s30  ;;  %s223_s21 = int_to_ptr.vmem [resolvable:$true] %s222_s21 }
  0x1d   : > { %p584_p1 = scmp.ge.s32.totalorder %s858_s17, 1  ;;  %p252_p2 = scmp.lt.s32.totalorder %s858_s17, 3 }
  0x1e   : > { %s575_s5 = sshll.u32 %s955_s28, 4  ;;  %s597_s30 = sadd.s32 8, %s958_s29 }
  0x1f   : > { %s191_s6 = scalar_lea.hbm %s1072_s0, %s958_s29  ;;  %p980_p3 = pnand %p584_p1, %p252_p2 }
  0x20   : > { %s192_s9 = sshll.u32 %s191_s6, 4  ;;  %s184_s10 = scalar_lea.vmem [#allocation2], %s575_s5  ;;  %s193_s9 = int_to_ptr.hbm [resolvable:$true] %s192_s9 }
  0x21   : > { %s218_s11 = scalar_lea.hbm %s1074_s1, %s958_s29  ;;  %s194_s19 = sshll.u32 %s184_s10, 4  ;;  %s195_s19 = int_to_ptr.vmem [resolvable:$true] %s194_s19 }
  0x22   : > { %s220_s23 = sshll.u32 %s218_s11, 4  ;;  %s181_s11 = scalar_lea.sflag [#allocation3], %s955_s28  ;;  %s221_s23 = int_to_ptr.hbm [resolvable:$true] %s220_s23 }
  0x23   : > { %614 = dma.hbm_to_vmem [thread:$0]  (!%p967_p0), %s221_s23, 128, %s223_s21, %s205_s4  }
  0x24   : > { %s860_s0 = smov 128   ;;  %s861_s1 = smov 8  }
  0x25   : > { %611 = dma.hbm_to_vmem [thread:$0]  (!%p967_p0), %s193_s9, 256, %s195_s19, %s181_s11, %s860_s0, %s860_s0, %s861_s1  }
  0x26   : > { %s233_s21 = scalar_lea.vmem [#allocation7], %s578_s8  ;;  %s243_s26 = scalar_lea.hbm %s1057_s2, %s597_s30 }
  0x27   : > { %s247_s23 = sshll.u32 %s233_s21, 4  ;;  %s245_s14 = sshll.u32 %s243_s26, 4  ;;  %s248_s23 = int_to_ptr.vmem [resolvable:$true] %s247_s23  ;;  %s246_s14 = int_to_ptr.hbm [resolvable:$true] %s245_s14 }
  0x28   : > { %617 = dma.hbm_to_vmem [thread:$0]  (!%p967_p0), %s246_s14, 128, %s248_s23, %s205_s4  }
  0x29   : > { %256 = sbr.rel (%p980_p3) target bundleno = 208 (0xd0), region = 32  ;;  %s997_s28 = sand.u32 (!%p980_p3), 1, %s842_s13  }
  0x2a   : > { %s585_s0 = sshll.u32 (!%p980_p3), %s997_s28, 4  ;;  %s259_s1 = scalar_lea.sflag (!%p980_p3), [#allocation3], %s997_s28 }
  0x2b   : > { %s262_s16 = scalar_lea.vmem (!%p980_p3), [#allocation2], %s585_s0 }
  0x2e   : > { %825 = dma.done.wait (%p937_p8), %s259_s1, 256  }
  0x2f   : > { %827 = vsyncadd (%p937_p8), %s259_s1, 4294967040  ;;  %s268_s14 = sand.u32 1, %s917_s18   ;;  %s586_s20 = sshll.u32 %s997_s28, 3 }
  0x30   : > { %s269_s26 = scalar_lea.sflag [#allocation6], %s268_s14  ;;  %s272_s29 = scalar_lea.vmem [#allocation5], %s586_s20 }
  0x31   : > { %829 = dma.done.wait (%p937_p8), %s269_s26, 256  }
  0x32   : > { %831 = vsyncadd (%p937_p8), %s269_s26, 4294967040  ;;  %v326_v0 = vld [vmem:[%s262_s16] sm:$0xff]  ;;  %s862_s6 = smov 1   ;;  %s863_s7 = smov 127   ;;  %v327_v1 = vld [vmem:[%s262_s16 + $0x8] sm:$0xff]  ;;  %v330_v2 = vlaneseq }
  0x33   : > { %376 = vrot.lane.b32.xlu1 %v326_v0, %s862_s6  ;;  %369 = vrot.lane.b32.xlu0 %v326_v0, %s863_s7  ;;  %v353_v4 = vrot.slane %v326_v0, 7  ;;  %v354_v5 = vrot.slane %v327_v1, 7  ;;  %v339_v6 = vrot.slane %v326_v0, 1  ;;  %v340_v7 = vrot.slane %v327_v1, 1  ;;  %v328_v8 = vld [vmem:[%s272_s29] sm:$0xff]  ;;  %s282_s18 = scalar_lea.vmem [#allocation7], %s586_s20 }
  0x34   : > { %v331_v3 = vshrl.u32 %v330_v2, 7  ;;  %v360_v9 = vperm.slane %v328_v8, 7  ;;  %v329_v15 = vld [vmem:[%s282_s18] sm:$0xff]  ;;  %v334_v23 = vand.u32 127, %v330_v2  ;;  %s598_s24 = sshll.u32 %s850_s15, 4  ;;  %s315_s5 = scalar_lea.vmem [#allocation8], %s585_s0 }
  0x35   : > { %v346_v17 = vperm.slane %v329_v15, 0  ;;  %s433_s22 = scalar_lea.hbm %s1058_s3, %s598_s24  ;;  %s434_s9 = sshll.u32 %s315_s5, 4  ;;  %s435_s9 = int_to_ptr.vmem [resolvable:$true] %s434_s9 }
  0x36   : > { %vm355_vm0 = vcmp.lt.s32.totalorder %v331_v3, 1  ;;  %vm358_vm1 = vcmp.eq.s32.totalorder %v331_v3, 0  ;;  %vm341_vm2 = vcmp.lt.s32.totalorder %v331_v3, 7  ;;  %v332_v16 = vadd.s32 8, %v331_v3  ;;  %s436_s10 = sshll.u32 %s433_s22, 4  ;;  %s420_s15 = scalar_lea.sflag [#allocation4], %s997_s28  ;;  %s437_s10 = int_to_ptr.hbm [resolvable:$true] %s436_s10 }
  0x37   : > { %v357_v10 = vsel %vm355_vm0, %v354_v5, %v353_v4  ;;  %v342_v12 = vsel %vm341_vm2, %v339_v6, %v340_v7  ;;  %v343_v18 = vsel %vm341_vm2, %v340_v7, %v339_v6  ;;  %v356_v21 = vsel %vm355_vm0, %v353_v4, %v354_v5  ;;  %s786_s19 = sshra.s32 %s437_s10, 4  ;;  %s792_s23 = scalar_lea.hbm %s1058_s3, 32  ;;  %s787_s19 = int_to_ptr.hbm [resolvable:$true] %s786_s19 }
  0x38   : > { %v361_v11 = vsel %vm358_vm1, %v360_v9, %v357_v10  ;;  %vm345_vm3 = vcmp.eq.s32.totalorder %v332_v16, 15  ;;  %vm380_vm4 = vcmp.eq.s32.totalorder %v334_v23, 0  ;;  %vm373_vm5 = vcmp.eq.s32.totalorder %v334_v23, 127  ;;  %s788_s11 = scalar_lea.hbm %s787_s19, 16  ;;  %p793_p7 = scmp.lt.s32.totalorder %s787_s19, %s1058_s3 }
  0x39   : > { %v365_v13 = vsel %vm358_vm1, 0.0, %v361_v11  ;;  %v348_v19 = vsel %vm345_vm3, %v346_v17, %v343_v18  ;;  %p789_p4 = scmp.ne.s32.totalorder %s787_s19, %s788_s11  ;;  %p794_p8 = scmp.lt.s32.totalorder %s792_s23, %s788_s11 }
  0x3a   : > { %v367_v14 = vsub.f32 %v342_v12, %v365_v13  ;;  %v352_v20 = vsel %vm345_vm3, 0.0, %v348_v19 }
  0x3b   : > { %378 = vrot.lane.b32.xlu1 %v327_v1, %s862_s6  ;;  %371 = vrot.lane.b32.xlu0 %v327_v1, %s863_s7  ;;  %v368_v22 = vsub.f32 %v352_v20, %v356_v21  ;;  %p790_p5 = pnand %p789_p4, %p941_p9  ;;  %p795_p10 = por %p794_p8, %p793_p7 }
  0x3c   : > { %v385_v29 = vmul.f32 %v367_v14, %v367_v14 }
  0x3d   : > { %v386_v38 = vmul.f32 %v368_v22, %v368_v22  ;;  %p791_p6 = pneg %p790_p5 }
  0x3f   : > { %p796_p13 = pnand %p795_p10, %p791_p6 }
  0xa5   : > { %v377_v24 = vpop.permute.xlu1 %376  ;;  %v370_v25 = vpop.permute.xlu0 %369 }
  0xa6   : > { %v381_v26 = vsel %vm380_vm4, 0.0, %v377_v24  ;;  %v374_v27 = vsel %vm373_vm5, 0.0, %v370_v25 }
  0xa7   : > { %v383_v28 = vsub.f32 %v374_v27, %v381_v26 }
  0xa9   : > { %v387_v30 = vmul.f32 %v383_v28, %v383_v28 }
  0xab   : > { %v389_v31 = vadd.f32 %v387_v30, %v385_v29 }
  0xad   : > { %v391_v32 = vadd.f32 1e-06, %v389_v31  ;;  %v379_v33 = vpop.permute.xlu1 %378  ;;  %v372_v34 = vpop.permute.xlu0 %371 }
  0xae   : > { %v382_v35 = vsel %vm380_vm4, 0.0, %v379_v33  ;;  %v375_v36 = vsel %vm373_vm5, 0.0, %v372_v34 }
  0xaf   : > { %678 = vrsqrt.f32 %v391_v32  ;;  %v384_v37 = vsub.f32 %v375_v36, %v382_v35  ;;  %vm400_vm6 = vcmp.eq.f32.partialorder %v391_v32, inf  ;;  %v403_v52 = vand.u32 2147483648, %v391_v32 }
  0xb0   : > { %vm402_vm7 = vcmp.eq.f32.partialorder %v391_v32, 0.0 }
  0xb1   : > { %v388_v39 = vmul.f32 %v384_v37, %v384_v37 }
  0xb3   : > { %v390_v40 = vadd.f32 %v388_v39, %v386_v38 }
  0xb5   : > { %v679_v41 = vpop.eup %678  ;;  %v392_v42 = vadd.f32 1e-06, %v390_v40 }
  0xb6   : > { %v394_v43 = vmul.f32 %v679_v41, %v391_v32 }
  0xb7   : > { %680 = vrsqrt.f32 %v392_v42  ;;  %vm412_vm8 = vcmp.eq.f32.partialorder %v392_v42, inf  ;;  %v415_v59 = vand.u32 2147483648, %v392_v42  ;;  %vm414_vm9 = vcmp.eq.f32.partialorder %v392_v42, 0.0 }
  0xb8   : > { %v395_v44 = vmul.f32 %v679_v41, %v394_v43 }
  0xba   : > { %v396_v45 = vmul.f32 0.5, %v395_v44 }
  0xbc   : > { %v397_v46 = vsub.f32 1.5, %v396_v45 }
  0xbd   : > { %v681_v47 = vpop.eup %680 }
  0xbe   : > { %v406_v48 = vmul.f32 %v681_v47, %v392_v42  ;;  %v398_v49 = vmul.f32 %v679_v41, %v397_v46 }
  0xc0   : > { %v399_v50 = vmul.f32 %v398_v49, %v391_v32  ;;  %v407_v51 = vmul.f32 %v681_v47, %v406_v48 }
  0xc2   : > { %v401_v53 = vsel %vm400_vm6, %v391_v32, %v399_v50  ;;  %v408_v54 = vmul.f32 0.5, %v407_v51 }
  0xc3   : > { %v404_v55 = vsel %vm402_vm7, %v403_v52, %v401_v53 }
  0xc4   : > { %v409_v56 = vsub.f32 1.5, %v408_v54  ;;  %417 = vst [vmem:[%s315_s5] sm:$0xff] %v404_v55 }
  0xc6   : > { %v410_v57 = vmul.f32 %v681_v47, %v409_v56 }
  0xc8   : > { %v411_v58 = vmul.f32 %v410_v57, %v392_v42 }
  0xca   : > { %v413_v60 = vsel %vm412_vm8, %v392_v42, %v411_v58 }
  0xcb   : > { %v416_v61 = vsel %vm414_vm9, %v415_v59, %v413_v60 }
  0xcc   : > { %418 = vst [vmem:[%s315_s5 + $0x8] sm:$0xff] %v416_v61 }
  0xcd   : > { %799 = shalt.err (!%p796_p13)
}
  0xce   : > { %s864_s28 = smov 128   ;;  %s865_s16 = smov 8  }
  0xcf   : > { %606 = dma.vmem_to_hbm [thread:$0]  (%p941_p9), %s435_s9, 256, %s437_s10, %s420_s15, %s864_s28, %s864_s28, %s865_s16  }
  0xd0 PF: > { %s451_s14 = sand.u32 1, %s838_s12   ;;  %p619_p0 = pnand %p574_p12, %p948_p11 }
  0xd1   : > { %s452_s20 = scalar_lea.sflag [#allocation4], %s451_s14 }
  0xd2   : > { %p620_p1 = pneg %p619_p0 }
  0xd4   : > { %833 = dma.done.wait (%p620_p1), %s452_s20, 256  }
  0xd5   : > { %835 = vsyncadd (%p620_p1), %s452_s20, 4294967040  ;;  %s22_s17 = sadd.s32 1, %s858_s17   ;;  %s1076_s26 = sld [smem:[#allocation12_spill]] }
  0xd6   : > { %p19_p2 = scmp.ge.s32.totalorder %s22_s17, 4   ;;  %s1077_s14 = sld [smem:[#allocation15_spill]] }
  0xd7   : > { %s1078_s15 = sld [smem:[#allocation13_spill]]  ;;  %s1080_s12 = smov %s842_s13 }
  0xd8   : > { %s1079_s16 = sld [smem:[#allocation14_spill]]  ;;  %21 = sbr.rel (!%p19_p2) target bundleno = 11 (0xb), region = 101 }
  0xdb   : > { %s1081_s13 = smov %s1076_s26 }
  0xdd   :  { %458 = vsyncpa [#allocation3], 1 }
  0xde   :  { %460 = vsyncpa [#allocation3 + $0x1], 1 }
  0xdf   :  { %461 = vsyncpa [#allocation6], 1 }
  0xe0   :  { %463 = vsyncpa [#allocation6 + $0x1], 1 }
  0xe1   :  { %464 = vsyncpa [#allocation4], 1 }
  0xe2   :  { %466 = vsyncpa [#allocation4 + $0x1], 1 }

</bundles_post_ra>
